<compile_context>
chip_gen: v7x
topology: tpu7x:2x2x1
jax: 0.10.0
libtpu: 0.0.40
codegen_flags: <defaults>
</compile_context>

<pallas_src>
import math
import jax
import jax.numpy as jnp
from jax import lax
from jax.experimental import pallas as pl
from jax.experimental.pallas import tpu as pltpu


def _mha_kernel(x_ref, wqkv_ref, wo_ref, bqkv_ref, bo_ref,
                o_ref, heads_ref, *, num_heads, emb_size):
    # One grid step == one batch element.
    E = emb_size
    d = E // num_heads

    x = x_ref[0].astype(jnp.bfloat16)                       # (N, E)

    # Fused Q/K/V projection: one MXU pass, one bias broadcast.
    qkv = jnp.dot(x, wqkv_ref[...],
                  preferred_element_type=jnp.float32) + bqkv_ref[...]   # (N, 3E) f32
    q = qkv[:, :E].astype(jnp.bfloat16)        # scale already folded into Wq/bq
    k = qkv[:, E:2 * E].astype(jnp.bfloat16)
    v = qkv[:, 2 * E:].astype(jnp.bfloat16)

    # Per-head attention; small static loop, results written straight into a
    # lane-dense VMEM scratch slab (no concatenate).
    for h in range(num_heads):
        sl = slice(h * d, (h + 1) * d)
        # energy = q_h @ k_h^T without materializing a transpose (NT matmul).
        energy = lax.dot_general(
            q[:, sl], k[:, sl],
            dimension_numbers=(((1,), (1,)), ((), ())),
            preferred_element_type=jnp.float32)              # (N, N) f32

        # Numerically stable softmax; reciprocal goes to the EUP.
        m = jnp.max(energy, axis=-1, keepdims=True)
        e = jnp.exp(energy - m)
        inv = pl.reciprocal(jnp.sum(e, axis=-1, keepdims=True), approx=True)
        att = (e * inv).astype(jnp.bfloat16)

        heads_ref[:, sl] = jnp.dot(att, v[:, sl],
                                   preferred_element_type=jnp.float32)  # (N, d)

    # Final projection on the full (N, E) slab.
    out = jnp.dot(heads_ref[...].astype(jnp.bfloat16), wo_ref[...],
                  preferred_element_type=jnp.float32) + bo_ref[...]
    o_ref[0] = out.astype(o_ref.dtype)


def multi_head_attention(x, params, *, num_heads):
    """x: (B, N, E) float32. params: dict of weights/biases (PyTorch Linear layout)."""
    B, N, E = x.shape
    assert E % num_heads == 0, "emb_size must be divisible by num_heads"

    # Fold the 1/sqrt(emb_size) scale (torch code: softmax(energy / sqrt(E)))
    # into the Q projection -- free at call time.
    scale = 1.0 / math.sqrt(E)
    wq = params["wq"] * scale
    bq = params["bq"] * scale

    # Pre-transpose to (in, out) and fuse Q/K/V; cast weights to bf16.
    wqkv_t = jnp.concatenate([wq.T, params["wk"].T, params["wv"].T],
                             axis=1).astype(jnp.bfloat16)                 # (E, 3E)
    bqkv = jnp.concatenate([bq, params["bk"], params["bv"]]
                           ).reshape(1, 3 * E).astype(jnp.float32)        # (1, 3E)
    wo_t = params["wo"].T.astype(jnp.bfloat16)                            # (E, E)
    bo = params["bo"].reshape(1, E).astype(jnp.float32)                   # (1, E)

    kernel = lambda *refs: _mha_kernel(*refs, num_heads=num_heads, emb_size=E)

    # NOTE: block dims equal the full array extents here, which satisfies the
    # (8, 128) tiling rule for this configuration.
    return pl.pallas_call(
        kernel,
        out_shape=jax.ShapeDtypeStruct((B, N, E), x.dtype),
        grid_spec=pltpu.PrefetchScalarGridSpec(
            num_scalar_prefetch=0,
            grid=(B,),
            in_specs=[
                pl.BlockSpec((1, N, E), lambda b: (b, 0, 0)),   # x block
                pl.BlockSpec((E, 3 * E), lambda b: (0, 0)),     # fused Wqkv^T (resident)
                pl.BlockSpec((E, E), lambda b: (0, 0)),         # Wo^T         (resident)
                pl.BlockSpec((1, 3 * E), lambda b: (0, 0)),     # fused bias
                pl.BlockSpec((1, E), lambda b: (0, 0)),         # bo
            ],
            out_specs=pl.BlockSpec((1, N, E), lambda b: (b, 0, 0)),
            scratch_shapes=[pltpu.VMEM((N, E), jnp.float32)],   # per-head output slab
        ),
        compiler_params=pltpu.CompilerParams(
            dimension_semantics=("parallel",)),
    )(x, wqkv_t, wo_t, bqkv, bo)


def _reference(x, params, num_heads):
    """Pure-JAX f32 reference mirroring the PyTorch forward (mask=None, eval mode)."""
    B, N, E = x.shape
    d = E // num_heads

    def lin(x, w, b):
        return jnp.einsum("bne,oe->bno", x, w) + b

    def split(t):  # b n (h d) -> b h n d
        return t.reshape(B, N, num_heads, d).transpose(0, 2, 1, 3)

    q = split(lin(x, params["wq"], params["bq"]))
    k = split(lin(x, params["wk"], params["bk"]))
    v = split(lin(x, params["wv"], params["bv"]))
    energy = jnp.einsum("bhqd,bhkd->bhqk", q, k)
    att = jax.nn.softmax(energy / (E ** 0.5), axis=-1)
    out = jnp.einsum("bhal,bhlv->bhav", att, v)
    out = out.transpose(0, 2, 1, 3).reshape(B, N, E)
    return jnp.einsum("bne,oe->bno", out, params["wo"]) + params["bo"]


if __name__ == "__main__":
    B, N, E, H = 2, 8, 32, 4
    key = jax.random.PRNGKey(0)
    keys = jax.random.split(key, 9)

    # Deterministic PyTorch-like init: U(-1/sqrt(in), 1/sqrt(in))
    bound = 1.0 / math.sqrt(E)
    u = lambda k, shape: jax.random.uniform(k, shape, jnp.float32, -bound, bound)

    params = {
        "wq": u(keys[0], (E, E)), "bq": u(keys[1], (E,)),
        "wk": u(keys[2], (E, E)), "bk": u(keys[3], (E,)),
        "wv": u(keys[4], (E, E)), "bv": u(keys[5], (E,)),
        "wo": u(keys[6], (E, E)), "bo": u(keys[7], (E,)),
    }
    x = jax.random.normal(keys[8], (B, N, E), jnp.float32)

    out = multi_head_attention(x, params, num_heads=H)
    out = jax.block_until_ready(out)

    ref = _reference(x, params, H)
    assert out.shape == (B, N, E)
    # bf16 MXU operands + approximate reciprocal -> compare with relaxed tolerance.
    assert jnp.allclose(out, ref, atol=2e-2, rtol=2e-2), "mismatch vs reference"

    print("KERNEL_OK")
</pallas_src>

<mosaic_0001>
module attributes {stable_mosaic.version = 11 : i64} {
  func.func @_lambda_(%arg0: i32, %arg1: memref<1x8x32xf32, #tpu.memory_space<vmem>>, %arg2: memref<32x96xbf16, #tpu.memory_space<vmem>>, %arg3: memref<32x32xbf16, #tpu.memory_space<vmem>>, %arg4: memref<1x96xf32, #tpu.memory_space<vmem>>, %arg5: memref<1x32xf32, #tpu.memory_space<vmem>>, %arg6: memref<1x8x32xf32, #tpu.memory_space<vmem>>, %arg7: memref<8x32xf32, #tpu.memory_space<vmem>>) attributes {dimension_semantics = [#tpu.dimension_semantics<parallel>], iteration_bounds = array<i64: 2>, scalar_prefetch = 0 : i64, scratch_operands = 1 : i64, tpu.core_type = #tpu.core_type<tc>, window_params = [{transform_indices = @transform_0, window_bounds = array<i64: 1, 8, 32>}, {pipeline_mode = #tpu.pipeline_mode<synchronous>, transform_indices = @transform_1, window_bounds = array<i64: 32, 96>}, {pipeline_mode = #tpu.pipeline_mode<synchronous>, transform_indices = @transform_2, window_bounds = array<i64: 32, 32>}, {pipeline_mode = #tpu.pipeline_mode<synchronous>, transform_indices = @transform_3, window_bounds = array<i64: 1, 96>}, {pipeline_mode = #tpu.pipeline_mode<synchronous>, transform_indices = @transform_4, window_bounds = array<i64: 1, 32>}, {transform_indices = @transform_5, window_bounds = array<i64: 1, 8, 32>}]} {
    %c0 = arith.constant 0 : index
    %c0_0 = arith.constant 0 : index
    %c0_1 = arith.constant 0 : index
    %0 = vector.load %arg1[%c0, %c0_0, %c0_1] : memref<1x8x32xf32, #tpu.memory_space<vmem>>, vector<1x8x32xf32>
    %1 = vector.shape_cast %0 : vector<1x8x32xf32> to vector<8x32xf32>
    %2 = arith.truncf %1 : vector<8x32xf32> to vector<8x32xbf16>
    %c0_2 = arith.constant 0 : index
    %c0_3 = arith.constant 0 : index
    %3 = vector.load %arg2[%c0_2, %c0_3] : memref<32x96xbf16, #tpu.memory_space<vmem>>, vector<32x96xbf16>
    %cst = arith.constant dense<0.000000e+00> : vector<8x96xf32>
    %4 = tpu.matmul %2, %3, %cst {dimension_numbers = #tpu.dot_dimension_numbers<[1], [0], [0], [1], [0, 0, 1, 1], [], []>} : vector<8x32xbf16>, vector<32x96xbf16>, vector<8x96xf32> -> vector<8x96xf32>
    %c0_4 = arith.constant 0 : index
    %c0_5 = arith.constant 0 : index
    %5 = vector.load %arg4[%c0_4, %c0_5] : memref<1x96xf32, #tpu.memory_space<vmem>>, vector<1x96xf32>
    %6 = vector.broadcast %5 : vector<1x96xf32> to vector<8x96xf32>
    %7 = arith.addf %4, %6 : vector<8x96xf32>
    %8 = vector.extract_strided_slice %7 {offsets = [0, 0], sizes = [8, 32], strides = [1, 1]} : vector<8x96xf32> to vector<8x32xf32>
    %9 = arith.truncf %8 : vector<8x32xf32> to vector<8x32xbf16>
    %10 = vector.extract_strided_slice %7 {offsets = [0, 32], sizes = [8, 32], strides = [1, 1]} : vector<8x96xf32> to vector<8x32xf32>
    %11 = arith.truncf %10 : vector<8x32xf32> to vector<8x32xbf16>
    %12 = vector.extract_strided_slice %7 {offsets = [0, 64], sizes = [8, 32], strides = [1, 1]} : vector<8x96xf32> to vector<8x32xf32>
    %13 = arith.truncf %12 : vector<8x32xf32> to vector<8x32xbf16>
    %14 = vector.extract_strided_slice %9 {offsets = [0, 0], sizes = [8, 8], strides = [1, 1]} : vector<8x32xbf16> to vector<8x8xbf16>
    %15 = vector.extract_strided_slice %11 {offsets = [0, 0], sizes = [8, 8], strides = [1, 1]} : vector<8x32xbf16> to vector<8x8xbf16>
    %cst_6 = arith.constant dense<0.000000e+00> : vector<8x8xf32>
    %16 = tpu.matmul %14, %15, %cst_6 {dimension_numbers = #tpu.dot_dimension_numbers<[1], [1], [0], [0], [0, 0, 1, 0], [], []>} : vector<8x8xbf16>, vector<8x8xbf16>, vector<8x8xf32> -> vector<8x8xf32>
    %cst_7 = arith.constant dense<0xFF800000> : vector<8xf32>
    %17 = vector.multi_reduction <maximumf>, %16, %cst_7 [1] : vector<8x8xf32> to vector<8xf32>
    %18 = vector.shape_cast %17 : vector<8xf32> to vector<8x1xf32>
    %19 = vector.broadcast %18 : vector<8x1xf32> to vector<8x8xf32>
    %20 = arith.subf %16, %19 : vector<8x8xf32>
    %21 = math.exp %20 : vector<8x8xf32>
    %cst_8 = arith.constant dense<0.000000e+00> : vector<8xf32>
    %22 = vector.multi_reduction <add>, %21, %cst_8 [1] : vector<8x8xf32> to vector<8xf32>
    %23 = vector.shape_cast %22 : vector<8xf32> to vector<8x1xf32>
    %24 = tpu.reciprocal %23 {approx = true} : vector<8x1xf32> -> vector<8x1xf32>
    %25 = vector.broadcast %24 : vector<8x1xf32> to vector<8x8xf32>
    %26 = arith.mulf %21, %25 : vector<8x8xf32>
    %27 = arith.truncf %26 : vector<8x8xf32> to vector<8x8xbf16>
    %28 = vector.extract_strided_slice %13 {offsets = [0, 0], sizes = [8, 8], strides = [1, 1]} : vector<8x32xbf16> to vector<8x8xbf16>
    %cst_9 = arith.constant dense<0.000000e+00> : vector<8x8xf32>
    %29 = tpu.matmul %27, %28, %cst_9 {dimension_numbers = #tpu.dot_dimension_numbers<[1], [0], [0], [1], [0, 0, 1, 1], [], []>} : vector<8x8xbf16>, vector<8x8xbf16>, vector<8x8xf32> -> vector<8x8xf32>
    %c0_10 = arith.constant 0 : index
    %c0_11 = arith.constant 0 : index
    %30 = vector.load %arg7[%c0_10, %c0_11] : memref<8x32xf32, #tpu.memory_space<vmem>>, vector<8x8xf32>
    tpu.vector_store %arg7[%c0_10, %c0_11], %29 {strides = array<i32>} : memref<8x32xf32, #tpu.memory_space<vmem>>, vector<8x8xf32>,
    %31 = vector.extract_strided_slice %9 {offsets = [0, 8], sizes = [8, 8], strides = [1, 1]} : vector<8x32xbf16> to vector<8x8xbf16>
    %32 = vector.extract_strided_slice %11 {offsets = [0, 8], sizes = [8, 8], strides = [1, 1]} : vector<8x32xbf16> to vector<8x8xbf16>
    %cst_12 = arith.constant dense<0.000000e+00> : vector<8x8xf32>
    %33 = tpu.matmul %31, %32, %cst_12 {dimension_numbers = #tpu.dot_dimension_numbers<[1], [1], [0], [0], [0, 0, 1, 0], [], []>} : vector<8x8xbf16>, vector<8x8xbf16>, vector<8x8xf32> -> vector<8x8xf32>
    %cst_13 = arith.constant dense<0xFF800000> : vector<8xf32>
    %34 = vector.multi_reduction <maximumf>, %33, %cst_13 [1] : vector<8x8xf32> to vector<8xf32>
    %35 = vector.shape_cast %34 : vector<8xf32> to vector<8x1xf32>
    %36 = vector.broadcast %35 : vector<8x1xf32> to vector<8x8xf32>
    %37 = arith.subf %33, %36 : vector<8x8xf32>
    %38 = math.exp %37 : vector<8x8xf32>
    %cst_14 = arith.constant dense<0.000000e+00> : vector<8xf32>
    %39 = vector.multi_reduction <add>, %38, %cst_14 [1] : vector<8x8xf32> to vector<8xf32>
    %40 = vector.shape_cast %39 : vector<8xf32> to vector<8x1xf32>
    %41 = tpu.reciprocal %40 {approx = true} : vector<8x1xf32> -> vector<8x1xf32>
    %42 = vector.broadcast %41 : vector<8x1xf32> to vector<8x8xf32>
    %43 = arith.mulf %38, %42 : vector<8x8xf32>
    %44 = arith.truncf %43 : vector<8x8xf32> to vector<8x8xbf16>
    %45 = vector.extract_strided_slice %13 {offsets = [0, 8], sizes = [8, 8], strides = [1, 1]} : vector<8x32xbf16> to vector<8x8xbf16>
    %cst_15 = arith.constant dense<0.000000e+00> : vector<8x8xf32>
    %46 = tpu.matmul %44, %45, %cst_15 {dimension_numbers = #tpu.dot_dimension_numbers<[1], [0], [0], [1], [0, 0, 1, 1], [], []>} : vector<8x8xbf16>, vector<8x8xbf16>, vector<8x8xf32> -> vector<8x8xf32>
    %c0_16 = arith.constant 0 : index
    %c8 = arith.constant 8 : index
    %47 = vector.load %arg7[%c0_16, %c8] : memref<8x32xf32, #tpu.memory_space<vmem>>, vector<8x8xf32>
    tpu.vector_store %arg7[%c0_16, %c8], %46 {strides = array<i32>} : memref<8x32xf32, #tpu.memory_space<vmem>>, vector<8x8xf32>,
    %48 = vector.extract_strided_slice %9 {offsets = [0, 16], sizes = [8, 8], strides = [1, 1]} : vector<8x32xbf16> to vector<8x8xbf16>
    %49 = vector.extract_strided_slice %11 {offsets = [0, 16], sizes = [8, 8], strides = [1, 1]} : vector<8x32xbf16> to vector<8x8xbf16>
    %cst_17 = arith.constant dense<0.000000e+00> : vector<8x8xf32>
    %50 = tpu.matmul %48, %49, %cst_17 {dimension_numbers = #tpu.dot_dimension_numbers<[1], [1], [0], [0], [0, 0, 1, 0], [], []>} : vector<8x8xbf16>, vector<8x8xbf16>, vector<8x8xf32> -> vector<8x8xf32>
    %cst_18 = arith.constant dense<0xFF800000> : vector<8xf32>
    %51 = vector.multi_reduction <maximumf>, %50, %cst_18 [1] : vector<8x8xf32> to vector<8xf32>
    %52 = vector.shape_cast %51 : vector<8xf32> to vector<8x1xf32>
    %53 = vector.broadcast %52 : vector<8x1xf32> to vector<8x8xf32>
    %54 = arith.subf %50, %53 : vector<8x8xf32>
    %55 = math.exp %54 : vector<8x8xf32>
    %cst_19 = arith.constant dense<0.000000e+00> : vector<8xf32>
    %56 = vector.multi_reduction <add>, %55, %cst_19 [1] : vector<8x8xf32> to vector<8xf32>
    %57 = vector.shape_cast %56 : vector<8xf32> to vector<8x1xf32>
    %58 = tpu.reciprocal %57 {approx = true} : vector<8x1xf32> -> vector<8x1xf32>
    %59 = vector.broadcast %58 : vector<8x1xf32> to vector<8x8xf32>
    %60 = arith.mulf %55, %59 : vector<8x8xf32>
    %61 = arith.truncf %60 : vector<8x8xf32> to vector<8x8xbf16>
    %62 = vector.extract_strided_slice %13 {offsets = [0, 16], sizes = [8, 8], strides = [1, 1]} : vector<8x32xbf16> to vector<8x8xbf16>
    %cst_20 = arith.constant dense<0.000000e+00> : vector<8x8xf32>
    %63 = tpu.matmul %61, %62, %cst_20 {dimension_numbers = #tpu.dot_dimension_numbers<[1], [0], [0], [1], [0, 0, 1, 1], [], []>} : vector<8x8xbf16>, vector<8x8xbf16>, vector<8x8xf32> -> vector<8x8xf32>
    %c0_21 = arith.constant 0 : index
    %c16 = arith.constant 16 : index
    %64 = vector.load %arg7[%c0_21, %c16] : memref<8x32xf32, #tpu.memory_space<vmem>>, vector<8x8xf32>
    tpu.vector_store %arg7[%c0_21, %c16], %63 {strides = array<i32>} : memref<8x32xf32, #tpu.memory_space<vmem>>, vector<8x8xf32>,
    %65 = vector.extract_strided_slice %9 {offsets = [0, 24], sizes = [8, 8], strides = [1, 1]} : vector<8x32xbf16> to vector<8x8xbf16>
    %66 = vector.extract_strided_slice %11 {offsets = [0, 24], sizes = [8, 8], strides = [1, 1]} : vector<8x32xbf16> to vector<8x8xbf16>
    %cst_22 = arith.constant dense<0.000000e+00> : vector<8x8xf32>
    %67 = tpu.matmul %65, %66, %cst_22 {dimension_numbers = #tpu.dot_dimension_numbers<[1], [1], [0], [0], [0, 0, 1, 0], [], []>} : vector<8x8xbf16>, vector<8x8xbf16>, vector<8x8xf32> -> vector<8x8xf32>
    %cst_23 = arith.constant dense<0xFF800000> : vector<8xf32>
    %68 = vector.multi_reduction <maximumf>, %67, %cst_23 [1] : vector<8x8xf32> to vector<8xf32>
    %69 = vector.shape_cast %68 : vector<8xf32> to vector<8x1xf32>
    %70 = vector.broadcast %69 : vector<8x1xf32> to vector<8x8xf32>
    %71 = arith.subf %67, %70 : vector<8x8xf32>
    %72 = math.exp %71 : vector<8x8xf32>
    %cst_24 = arith.constant dense<0.000000e+00> : vector<8xf32>
    %73 = vector.multi_reduction <add>, %72, %cst_24 [1] : vector<8x8xf32> to vector<8xf32>
    %74 = vector.shape_cast %73 : vector<8xf32> to vector<8x1xf32>
    %75 = tpu.reciprocal %74 {approx = true} : vector<8x1xf32> -> vector<8x1xf32>
    %76 = vector.broadcast %75 : vector<8x1xf32> to vector<8x8xf32>
    %77 = arith.mulf %72, %76 : vector<8x8xf32>
    %78 = arith.truncf %77 : vector<8x8xf32> to vector<8x8xbf16>
    %79 = vector.extract_strided_slice %13 {offsets = [0, 24], sizes = [8, 8], strides = [1, 1]} : vector<8x32xbf16> to vector<8x8xbf16>
    %cst_25 = arith.constant dense<0.000000e+00> : vector<8x8xf32>
    %80 = tpu.matmul %78, %79, %cst_25 {dimension_numbers = #tpu.dot_dimension_numbers<[1], [0], [0], [1], [0, 0, 1, 1], [], []>} : vector<8x8xbf16>, vector<8x8xbf16>, vector<8x8xf32> -> vector<8x8xf32>
    %c0_26 = arith.constant 0 : index
    %c24 = arith.constant 24 : index
    %81 = vector.load %arg7[%c0_26, %c24] : memref<8x32xf32, #tpu.memory_space<vmem>>, vector<8x8xf32>
    tpu.vector_store %arg7[%c0_26, %c24], %80 {strides = array<i32>} : memref<8x32xf32, #tpu.memory_space<vmem>>, vector<8x8xf32>,
    %c0_27 = arith.constant 0 : index
    %c0_28 = arith.constant 0 : index
    %82 = vector.load %arg7[%c0_27, %c0_28] : memref<8x32xf32, #tpu.memory_space<vmem>>, vector<8x32xf32>
    %83 = arith.truncf %82 : vector<8x32xf32> to vector<8x32xbf16>
    %c0_29 = arith.constant 0 : index
    %c0_30 = arith.constant 0 : index
    %84 = vector.load %arg3[%c0_29, %c0_30] : memref<32x32xbf16, #tpu.memory_space<vmem>>, vector<32x32xbf16>
    %cst_31 = arith.constant dense<0.000000e+00> : vector<8x32xf32>
    %85 = tpu.matmul %83, %84, %cst_31 {dimension_numbers = #tpu.dot_dimension_numbers<[1], [0], [0], [1], [0, 0, 1, 1], [], []>} : vector<8x32xbf16>, vector<32x32xbf16>, vector<8x32xf32> -> vector<8x32xf32>
    %c0_32 = arith.constant 0 : index
    %c0_33 = arith.constant 0 : index
    %86 = vector.load %arg5[%c0_32, %c0_33] : memref<1x32xf32, #tpu.memory_space<vmem>>, vector<1x32xf32>
    %87 = vector.broadcast %86 : vector<1x32xf32> to vector<8x32xf32>
    %88 = arith.addf %85, %87 : vector<8x32xf32>
    %c0_34 = arith.constant 0 : index
    %c0_35 = arith.constant 0 : index
    %c0_36 = arith.constant 0 : index
    %89 = vector.load %arg6[%c0_34, %c0_35, %c0_36] : memref<1x8x32xf32, #tpu.memory_space<vmem>>, vector<1x8x32xf32>
    %90 = vector.shape_cast %89 : vector<1x8x32xf32> to vector<8x32xf32>
    %91 = vector.shape_cast %88 : vector<8x32xf32> to vector<1x8x32xf32>
    tpu.vector_store %arg6[%c0_34, %c0_35, %c0_36], %91 {strides = array<i32>} : memref<1x8x32xf32, #tpu.memory_space<vmem>>, vector<1x8x32xf32>,
    return
  }
  func.func @transform_0(%arg0: i32) -> (i32, i32, i32) {
    %c0_i32 = arith.constant 0 : i32
    %c0_i32_0 = arith.constant 0 : i32
    %c0_i32_1 = arith.constant 0 : i32
    return %arg0, %c0_i32, %c0_i32_0 : i32, i32, i32
  }
  func.func @transform_1(%arg0: i32) -> (i32, i32) {
    %c0_i32 = arith.constant 0 : i32
    %c0_i32_0 = arith.constant 0 : i32
    %c0_i32_1 = arith.constant 0 : i32
    return %c0_i32, %c0_i32_0 : i32, i32
  }
  func.func @transform_2(%arg0: i32) -> (i32, i32) {
    %c0_i32 = arith.constant 0 : i32
    %c0_i32_0 = arith.constant 0 : i32
    %c0_i32_1 = arith.constant 0 : i32
    return %c0_i32, %c0_i32_0 : i32, i32
  }
  func.func @transform_3(%arg0: i32) -> (i32, i32) {
    %c0_i32 = arith.constant 0 : i32
    %c0_i32_0 = arith.constant 0 : i32
    %c0_i32_1 = arith.constant 0 : i32
    return %c0_i32, %c0_i32_0 : i32, i32
  }
  func.func @transform_4(%arg0: i32) -> (i32, i32) {
    %c0_i32 = arith.constant 0 : i32
    %c0_i32_0 = arith.constant 0 : i32
    %c0_i32_1 = arith.constant 0 : i32
    return %c0_i32, %c0_i32_0 : i32, i32
  }
  func.func @transform_5(%arg0: i32) -> (i32, i32, i32) {
    %c0_i32 = arith.constant 0 : i32
    %c0_i32_0 = arith.constant 0 : i32
    %c0_i32_1 = arith.constant 0 : i32
    return %arg0, %c0_i32, %c0_i32_0 : i32, i32, i32
  }
}

</mosaic_0001>

<bundles_post_ra>
// kernel: tpu_custom_call.1
= control target key start
LH: loop header
LB: loop body
LE: loop exit
PB: predicated region body
PF: predicated region fallthrough
CT: control target
= control target key end

     0   :  { %10 = vsyncpa [#allocation4], 0  ;;  %s1718_s0 = inlined_call_operand.hbm [shape: f32[2,8,32], index: 0, kind: input, shape index: {}]   ;;  %s1719_s1 = inlined_call_operand.hbm [shape: bf16[32,96], index: 1, kind: input, shape index: {}]   ;;  %s1720_s2 = inlined_call_operand.hbm [shape: bf16[32,32], index: 2, kind: input, shape index: {}]   ;;  %s1721_s3 = inlined_call_operand.vmem [shape: f32[1,96], index: 3, kind: input, shape index: {}]   ;;  %s1722_s4 = inlined_call_operand.vmem [shape: f32[1,32], index: 4, kind: input, shape index: {}]   ;;  %s1723_s5 = inlined_call_operand.hbm [shape: f32[2,8,32], index: 5, kind: output, shape index: {}]  }
   0x1   :  { %12 = vsyncpa [#allocation4 + $0x1], 0 }
   0x2   :  { %13 = vsyncpa [#allocation7], 0 }
   0x3   :  { %14 = vsyncpa [#allocation5], 0 }
   0x4   :  { %16 = vsyncpa [#allocation5 + $0x1], 0  ;;  %s1405_s18 = smov 0   ;;  %s1407_s19 = smov 0  }
   0x5   :  { %s1409_s20 = smov 0   ;;  %s1411_s21 = smov 0  }
   0x6 LB: > { %s1426_s22 = sadd.s32 4294967295, %s1351_s21   ;;  %s972_s23 = sadd.s32 4294967294, %s1351_s21   ;;  %s1351_s21 = sphi %s1411_s21, %s1743_s21   ;;  %s1347_s20 = sphi %s1409_s20, %s1742_s20   ;;  %s1343_s19 = sphi %s1407_s19, %s1741_s19   ;;  %s1339_s18 = sphi %s1405_s18, %s1740_s18  }
   0x7   : > { %p42_p0 = scmp.ne.s32.totalorder %s1343_s19, %s1339_s18  ;;  %p1724_p1 = scmp.eq.s32.totalorder %s1426_s22, 0 }
   0x8   : > { %p156_p3 = scmp.eq.s32.totalorder %s972_s23, 1  ;;  %p973_p5 = scmp.ge.s32.totalorder %s1351_s21, 1 }
   0x9   : > { %p1435_p4 = por %p1724_p1, %p42_p0  ;;  %p163_p7 = scmp.lt.s32.totalorder %s1351_s21, 3 }
   0xa   : > { %p1440_p6 = por %p156_p3, %p42_p0  ;;  %s1353_s27 = smov [#allocation6]  }
   0xb   : > { %s1727_s24 = scalar_select %p1435_p4, 1, 0 }
   0xc   : > { %s1728_s25 = scalar_select %p1440_p6, 1, 0 }
   0xd   : > { %p1445_p8 = pnand %p973_p5, %p163_p7  ;;  %s175_s28 = sshll.u32 %s1353_s27, 4  ;;  %s1449_s28 = int_to_ptr.vmem [resolvable:$true] %s175_s28 }
   0xe   : > { %s1354_s30 = smov [#allocation8]   ;;  %s1195_s9 = scalar_lea.hbm %s1719_s1, 256 }
   0xf   : > { %p1102_p9 = pneg %p1445_p8  ;;  %s188_s6 = sshll.u32 %s1354_s30, 4  ;;  %s1460_s6 = int_to_ptr.vmem [resolvable:$true] %s188_s6 }
  0x10   : > { %p1196_p12 = scmp.ne.s32.totalorder %s1719_s1, %s1195_s9  ;;  %p1202_p5 = scmp.lt.u32.totalorder %s1195_s9, %s1719_s1 }
  0x11   : > { %p1456_p11 = pnand %p1102_p9, %p1724_p1 }
  0x13   : > { %p1197_p13 = pneg %p1456_p11 }
  0x15   : > { %p1198_p0 = pnand %p1197_p13, %p1196_p12 }
  0x17   : > { %p1199_p3 = pneg %p1198_p0 }
  0x19   : > { %p1204_p7 = pnand %p1202_p5, %p1199_p3 }
  0x1b   : > { %1207 = shalt.err (!%p1204_p7)
}
  0x1c   : > { %s1208_s14 = scalar_lea.vmem %s1449_s28, 256  ;;  %p1216_p2 = scmp.lt.s32.totalorder %s1449_s28, %s1449_s28 }
  0x1d   : > { %p1209_p9 = scmp.ne.s32.totalorder %s1449_s28, %s1208_s14  ;;  %p1217_p12 = scmp.lt.s32.totalorder %s1208_s14, %s1208_s14 }
  0x1f   : > { %p1211_p10 = pnand %p1209_p9, %p1197_p13  ;;  %p1218_p0 = por %p1217_p12, %p1216_p2 }
  0x21   : > { %p1212_p1 = pneg %p1211_p10 }
  0x23   : > { %p1219_p6 = pnand %p1218_p0, %p1212_p1 }
  0x25   : > { %1222 = shalt.err (!%p1219_p6)
}
  0x26   : > { %s1355_s15 = smov 64   ;;  %s1356_s16 = smov 4  }
  0x27   : > { %1105 = dma.hbm_to_vmem [thread:$0]  (!%p1456_p11), %s1719_s1, 256, %s1449_s28, [#allocation7], %s1355_s15, %s1355_s15, %s1356_s16  }
  0x28   : > { %s1223_s7 = scalar_lea.hbm %s1720_s2, 256 }
  0x29   : > { %p1224_p2 = scmp.ne.s32.totalorder %s1720_s2, %s1223_s7  ;;  %p1230_p10 = scmp.lt.u32.totalorder %s1223_s7, %s1720_s2 }
  0x2b   : > { %p1226_p1 = pnand %p1224_p2, %p1197_p13 }
  0x2d   : > { %p1227_p6 = pneg %p1226_p1 }
  0x2f   : > { %p1232_p3 = pnand %p1230_p10, %p1227_p6 }
  0x31   : > { %1235 = shalt.err (!%p1232_p3)
}
  0x32   : > { %s1236_s28 = scalar_lea.vmem %s1460_s6, 256  ;;  %p1244_p12 = scmp.lt.s32.totalorder %s1460_s6, %s1460_s6 }
  0x33   : > { %p1237_p5 = scmp.ne.s32.totalorder %s1460_s6, %s1236_s28  ;;  %p1245_p0 = scmp.lt.s32.totalorder %s1236_s28, %s1236_s28 }
  0x35   : > { %p1239_p7 = pnand %p1237_p5, %p1197_p13  ;;  %p1246_p2 = por %p1245_p0, %p1244_p12 }
  0x37   : > { %p1240_p9 = pneg %p1239_p7 }
  0x39   : > { %p1247_p1 = pnand %p1246_p2, %p1240_p9 }
  0x3b   : > { %1250 = shalt.err (!%p1247_p1)
}
  0x3c   : > { %1108 = dma.hbm_to_vmem [thread:$0]  (!%p1456_p11), %s1720_s2, 256, %s1460_s6, [#allocation7], %s1355_s15, %s1355_s15, %s1356_s16  }
  0x3d   : > { %s1515_s14 = sadd.s32 1, %s1351_s21   ;;  %s29_s29 = sadd.s32 1, %s1347_s20 }
  0x3e   : > { %s26_s17 = ssub.s32 %s1351_s21, %s1515_s14  ;;  %p36_p13 = scmp.ne.s32.totalorder %s1347_s20, %s1343_s19 }
  0x3f   : > { %p27_p6 = scmp.eq.s32.totalorder %s26_s17, 0  ;;  %p37_p10 = scmp.eq.s32.totalorder %s1351_s21, 0 }
  0x40   : > { %p1731_p3 = scmp.eq.s32.totalorder %s1426_s22, 1  ;;  %p1119_p7 = scmp.lt.s32.totalorder %s1351_s21, 2 }
  0x41   : > { %s1531_s27 = scalar_select %p27_p6, %s1347_s20, %s29_s29  }
  0x42   : > { %p1525_p5 = por %p1731_p3, %p36_p13  ;;  %p38_p9 = por %p37_p10, %p36_p13 }
  0x43   : > { %s208_s30 = sand.u32 1, %s1347_s20   ;;  %s978_s6 = sshll.u32 %s1351_s21, 7 }
  0x44   : > { %s1732_s23 = scalar_select %p1525_p5, 1, 0 }
  0x45   : > { %s977_s7 = sshll.u32 %s208_s30, 3  ;;  %s1538_s8 = scalar_lea.hbm %s1718_s0, %s978_s6 }
  0x46   : > { %s212_s9 = scalar_lea.vmem [#allocation3], %s977_s7  ;;  %p1542_p11 = pnand %p1119_p7, %p38_p9 }
  0x47   : > { %s219_s10 = sshll.u32 %s212_s9, 4  ;;  %s209_s28 = scalar_lea.sflag [#allocation4], %s208_s30  ;;  %s1540_s10 = int_to_ptr.vmem [resolvable:$true] %s219_s10 }
  0x48   : > { %s1251_s12 = scalar_lea.hbm %s1538_s8, 128  ;;  %p1253_p0 = pneg %p1542_p11 }
  0x49   : > { %p1252_p12 = scmp.ne.s32.totalorder %s1538_s8, %s1251_s12  ;;  %s1256_s17 = scalar_lea.hbm %s1718_s0, 256 }
  0x4a   : > { %p1257_p13 = scmp.lt.u32.totalorder %s1538_s8, %s1718_s0  ;;  %p1258_p6 = scmp.lt.u32.totalorder %s1256_s17, %s1251_s12 }
  0x4b   : > { %p1254_p2 = pnand %p1253_p0, %p1252_p12  ;;  %p1260_p3 = scmp.lt.u32.totalorder %s1251_s12, %s1538_s8 }
  0x4c   : > { %p1259_p10 = por %p1258_p6, %p1257_p13 }
  0x4d   : > { %p1255_p1 = pneg %p1254_p2 }
  0x4e   : > { %p1261_p7 = por %p1260_p3, %p1259_p10 }
  0x50   : > { %p1262_p9 = pnand %p1261_p7, %p1255_p1 }
  0x52   : > { %1265 = shalt.err (!%p1262_p9)
}
  0x53   : > { %s1266_s30 = scalar_lea.vmem %s1540_s10, 128  ;;  %s1357_s15 = smov [#allocation3]  }
  0x54   : > { %p1267_p12 = scmp.ne.s32.totalorder %s1540_s10, %s1266_s30  ;;  %s1271_s16 = sshll.u32 %s1357_s15, 4  ;;  %s1272_s16 = int_to_ptr.vmem [resolvable:$false] %s1271_s16 }
  0x55   : > { %s1273_s9 = scalar_lea.vmem %s1272_s16, 256  ;;  %p1274_p4 = scmp.lt.s32.totalorder %s1540_s10, %s1272_s16 }
  0x56   : > { %p1269_p2 = pnand %p1267_p12, %p1253_p0  ;;  %p1275_p13 = scmp.lt.s32.totalorder %s1273_s9, %s1266_s30 }
  0x58   : > { %p1270_p5 = pneg %p1269_p2  ;;  %p1276_p6 = por %p1275_p13, %p1274_p4 }
  0x5a   : > { %p1277_p10 = pnand %p1276_p6, %p1270_p5 }
  0x5c   : > { %1280 = shalt.err (!%p1277_p10)
}
  0x5d   : > { %1112 = dma.hbm_to_vmem [thread:$0]  (!%p1542_p11), %s1538_s8, 128, %s1540_s10, %s209_s28  }
  0x5e   : > { %228 = sbr.rel (%p1445_p8) target bundleno = 1609 (0x649), region = 40  ;;  %s1574_s12 = sand.u32 (!%p1445_p8), 1, %s1343_s19  }
  0x5f   : > { %s980_s13 = sshll.u32 (!%p1445_p8), %s1574_s12, 3  ;;  %s231_s29 = scalar_lea.sflag (!%p1445_p8), [#allocation4], %s1574_s12 }
  0x60   : > { %s234_s17 = scalar_lea.vmem (!%p1445_p8), [#allocation3], %s980_s13  ;;  %p1734_p4 = scmp.ne.s32.totalorder (!%p1445_p8), %s1727_s24, 0 }
  0x65   : > { %1326 = dma.done.wait (%p1734_p4), %s231_s29, 128  }
  0x66   : > { %1328 = vsyncadd (%p1734_p4), %s231_s29, 4294967168  ;;  %p1735_p5 = scmp.eq.s32.totalorder %s1426_s22, 0 }
  0x68   : > { %1330 = dma.done.wait (%p1735_p5), [#allocation7], 512   ;;  %p1736_p8 = pmov %p1735_p5 }
  0x69   : > { %v1358_v0 = vmov 0.0   ;;  %vm1359_vm0 = vmmov 0   ;;  %v1175_v1 = vld [vmem:[#allocation6] sm:$0xff]   ;;  %v1176_v2 = vld [vmem:[#allocation6 + $0x8] sm:$0xff]   ;;  %v270_v3 = vld [vmem:[%s234_s17] sm:$0xff]  ;;  %vm295_vm1 = vcmask 261120  }
  0x6a   : > { %1332 = vsyncadd (%p1736_p8), [#allocation7], 4294966784  ;;  %1026 = vmatprep.subr.bf16.mxu0 %v1358_v0  ;;  %1030 = vmatprep.mubr.msk.bf16.mxu0 %vm1359_vm0, %v1358_v0  ;;  %v271_v4 = vpack.c.bf16 %v270_v3, %v270_v3  ;;  %v984_v5 = vld [vmem:[%s1721_s3] ss:$0 sm:$0xff]  ;;  %s1360_s8 = smov 120   ;;  %s1361_s10 = smov 96  }
  0x6b   : > { %1034 = vmatprep.subr.bf16.mxu1 %v1358_v0  ;;  %1036 = vmatprep.mubr.msk.bf16.mxu1 %vm1359_vm0, %v1358_v0  ;;  %s1362_s11 = smov 80   ;;  %s1363_s28 = smov 88   ;;  %vm343_vm2 = vcmask 64512   ;;  %vm407_vm3 = vcmask 1043456   ;;  %vm566_vm4 = vcmask 130112   ;;  %vm682_vm5 = vcmask 195712  }
  0x6c   : > { %1027 = vmatpush3.bf16.msra.mxu0 %v1175_v1  ;;  %s1364_s7 = smov 72   ;;  %s1365_s6 = smov 112   ;;  %vm798_vm6 = vcmask 261312  }
  0x6d   : > { %1028 = vmatprep.subr.bf16.mxu0 %v1358_v0  ;;  %s1366_s30 = smov 104   ;;  %s1367_s15 = smov 56  }
  0x6e   : > { %s1368_s16 = smov 64   ;;  %s1369_s9 = smov 40  }
  0x6f   : > { %s1370_s29 = smov 48   ;;  %s1371_s17 = smov 8  }
  0x70   : > { %1029 = vmatpush3.bf16.msra.mxu0 %v1176_v2  ;;  %s1372_s24 = smov 16   ;;  %s1373_s26 = smov 24  }
  0x71   : > { %1040 = vmatprep.subr.bf16.mxu0 %v1358_v0  ;;  %p1737_p0 = scmp.ne.s32.totalorder %s1732_s23, 0 }
  0x73   : > { %1031 = vmatmul.mubr.msk.bf16.vlgmr.msra.gmra.mrb[0].mxu0 %vm295_vm1, %v271_v4 }
  0x74   : > { %1042 = vmatprep.mubr.msk.bf16.mxu0 %vm1359_vm0, %v1358_v0 }
 0x146   : > { %v333_v6 = vpop.f32.mrb[0].mxu0 }
 0x147   : > { %v334_v7 = vadd.f32 %v984_v5, %v333_v6  ;;  %v1032_v8 = vpop.f32.mrb[1].mxu0 }
 0x148   : > { %v336_v9 = vpop.f32.mrb[2].mxu0 }
 0x149   : > { %v1602_v10 = vpack.c.bf16 %v334_v7, %v334_v7  ;;  %v1033_v11 = vpop.f32.mrb[3].mxu0 }
 0x14b   : > { %452 = vrot.lane.b32.xlu1 %v1602_v10, %s1360_s8  ;;  %341 = vrot.lane.b32.xlu0 %v1602_v10, %s1361_s10 }
 0x14f   : > { %570 = vrot.lane.b32.xlu1 %v1602_v10, %s1362_s11  ;;  %454 = vrot.lane.b32.xlu0 %v1602_v10, %s1363_s28  ;;  %s1001_s11 = sshll.u32 %s1426_s22, 7  ;;  %s268_s28 = scalar_lea.vmem [#allocation9], %s980_s13 }
 0x150   : > { %s870_s22 = scalar_lea.sflag [#allocation5], %s1574_s12 }
 0x153   : > { %686 = vrot.lane.b32.xlu1 %v1602_v10, %s1364_s7  ;;  %568 = vrot.lane.b32.xlu0 %v1602_v10, %s1365_s6  ;;  %s883_s7 = sshll.u32 %s268_s28, 4  ;;  %s1675_s7 = int_to_ptr.vmem [resolvable:$true] %s883_s7 }
 0x154   : > { %s1281_s13 = scalar_lea.vmem %s1675_s7, 128 }
 0x155   : > { %p1282_p11 = scmp.ne.s32.totalorder %s1675_s7, %s1281_s13 }
 0x157   : > { %684 = vrot.lane.b32.xlu0 %v1602_v10, %s1366_s30  ;;  %p1283_p1 = pnand %p1282_p11, %p1737_p0 }
 0x159   : > { %p1284_p3 = pneg %p1283_p1 }
 0x1bd   : > { %v342_v12 = vpop.permute.xlu0 %341  ;;  %v453_v15 = vpop.permute.xlu1 %452 }
 0x1be   : > { %v348_v13 = vsel %vm343_vm2, %v342_v12, 0 }
 0x1bf   : > { %1035 = vmatpush3.bf16.xpose.msra.mxu1 %v348_v13 }
 0x1c0   : > { %1046 = vmatprep.subr.bf16.mxu1 %v1358_v0 }
 0x1c1   : > { %v455_v14 = vpop.permute.xlu0 %454  ;;  %v571_v17 = vpop.permute.xlu1 %570 }
 0x1c2   : > { %v460_v16 = vsel %vm343_vm2, %v455_v14, 0  ;;  %v576_v18 = vsel %vm343_vm2, %v571_v17, 0 }
 0x1c5   : > { %v687_v19 = vpop.permute.xlu1 %686  ;;  %v569_v20 = vpop.permute.xlu0 %568 }
 0x1c6   : > { %1037 = vmatmul.mubr.msk.bf16.vlgmr.msra.gmra.mrb[0].mxu1 %vm343_vm2, %v1602_v10  ;;  %v692_v21 = vsel %vm343_vm2, %v687_v19, 0 }
 0x1c7   : > { %1047 = vmatpush3.bf16.xpose.msra.mxu1 %v460_v16  ;;  %1048 = vmatprep.mubr.msk.bf16.mxu1 %vm1359_vm0, %v1358_v0 }
 0x1c8   : > { %1058 = vmatprep.subr.bf16.mxu1 %v1358_v0 }
 0x1c9   : > { %v685_v22 = vpop.permute.xlu0 %684 }
 0x1ce   : > { %1049 = vmatmul.mubr.msk.bf16.vlgmr.msra.gmra.mrb[4].mxu1 %vm343_vm2, %v453_v15 }
 0x1cf   : > { %1059 = vmatpush3.bf16.xpose.msra.mxu1 %v576_v18  ;;  %1060 = vmatprep.mubr.msk.bf16.mxu1 %vm1359_vm0, %v1358_v0 }
 0x1d0   : > { %1070 = vmatprep.subr.bf16.mxu1 %v1358_v0 }
 0x1d6   : > { %1061 = vmatmul.mubr.msk.bf16.vlgmr.msra.gmra.mrb[8].mxu1 %vm343_vm2, %v569_v20 }
 0x1d7   : > { %1071 = vmatpush3.bf16.xpose.msra.mxu1 %v692_v21  ;;  %1072 = vmatprep.mubr.msk.bf16.mxu1 %vm1359_vm0, %v1358_v0 }
 0x1d8   : > { %1082 = vmatprep.subr.bf16.mxu1 %v1358_v0 }
 0x1de   : > { %1073 = vmatmul.mubr.msk.bf16.vlgmr.msra.gmra.mrb[12].mxu1 %vm343_vm2, %v685_v22 }
 0x1df   : > { %1086 = vmatprep.mubr.msk.bf16.mxu1 %vm1359_vm0, %v1358_v0 }
 0x299   : > { %v384_v23 = vpop.f32.mrb[0].mxu1 }
 0x29a   : > { %v1038_v24 = vpop.f32.mrb[1].mxu1  ;;  %v390_v25 = vsel %vm343_vm2, %v384_v23, -inf }
 0x29b   : > { %391 = vmax.xlane.f32.xlu1 %v390_v25  ;;  %v387_v26 = vpop.f32.mrb[2].mxu1 }
 0x29c   : > { %v1039_v27 = vpop.f32.mrb[3].mxu1 }
 0x2a1   : > { %v496_v28 = vpop.f32.mrb[4].mxu1 }
 0x2a2   : > { %v1050_v29 = vpop.f32.mrb[5].mxu1  ;;  %v502_v30 = vsel %vm343_vm2, %v496_v28, -inf }
 0x2a3   : > { %503 = vmax.xlane.f32.xlu0 %v502_v30  ;;  %v499_v31 = vpop.f32.mrb[6].mxu1 }
 0x2a4   : > { %v1051_v32 = vpop.f32.mrb[7].mxu1 }
 0x2a5   : > { %v1177_v32 = vld [vmem:[#allocation8] sm:$0xff]  }
 0x2a6   : > { %1083 = vmatpush3.bf16.msra.mxu1 %v1177_v32 }
 0x2a7   : > { %1084 = vmatprep.subr.bf16.mxu1 %v1358_v0 }
 0x2a9   : > { %v612_v33 = vpop.f32.mrb[8].mxu1 }
 0x2aa   : > { %v1062_v34 = vpop.f32.mrb[9].mxu1  ;;  %v618_v35 = vsel %vm343_vm2, %v612_v33, -inf }
 0x2ab   : > { %619 = vmax.xlane.f32.xlu0 %v618_v35  ;;  %v615_v36 = vpop.f32.mrb[10].mxu1 }
 0x2ac   : > { %v1063_v37 = vpop.f32.mrb[11].mxu1 }
 0x2b1   : > { %v728_v38 = vpop.f32.mrb[12].mxu1 }
 0x2b2   : > { %v1074_v39 = vpop.f32.mrb[13].mxu1  ;;  %v734_v40 = vsel %vm343_vm2, %v728_v38, -inf }
 0x2b3   : > { %735 = vmax.xlane.f32.xlu1 %v734_v40  ;;  %v731_v41 = vpop.f32.mrb[14].mxu1 }
 0x2b4   : > { %v1075_v42 = vpop.f32.mrb[15].mxu1 }
 0x328   : > { %v392_v43 = vpop.xlane.xlu1 %391 }
 0x329   : > { %v393_v44 = vsub.f32 %v384_v23, %v392_v43 }
 0x32b   : > { %v394_v45 = vmul.f32 1.442695, %v393_v44 }
 0x32d   : > { %1179 = vpow2.f32 %v394_v45 }
 0x330   : > { %v504_v46 = vpop.xlane.xlu0 %503 }
 0x331   : > { %v505_v47 = vsub.f32 %v496_v28, %v504_v46  ;;  %v996_v46 = vld [vmem:[%s1722_s4] ss:$0 sm:$0xff] }
 0x333   : > { %v506_v48 = vmul.f32 1.442695, %v505_v47 }
 0x335   : > { %1181 = vpow2.f32 %v506_v48 }
 0x337   : > { %v1180_v49 = vpop.eup %1179 }
 0x338   : > { %v620_v50 = vpop.xlane.xlu0 %619  ;;  %v396_v51 = vsel %vm343_vm2, %v1180_v49, 0.0 }
 0x339   : > { %v621_v52 = vsub.f32 %v612_v33, %v620_v50  ;;  %397 = vadd.xlane.f32.xlu0 %v396_v51  ;;  %v1178_v33 = vld [vmem:[#allocation8 + $0x8] sm:$0xff]  }
 0x33a   : > { %1085 = vmatpush3.bf16.msra.mxu1 %v1178_v33 }
 0x33b   : > { %v622_v53 = vmul.f32 1.442695, %v621_v52 }
 0x33d   : > { %1183 = vpow2.f32 %v622_v53 }
 0x33f   : > { %v1182_v54 = vpop.eup %1181 }
 0x340   : > { %v508_v55 = vsel %vm343_vm2, %v1182_v54, 0.0  ;;  %v736_v58 = vpop.xlane.xlu1 %735 }
 0x341   : > { %509 = vadd.xlane.f32.xlu1 %v508_v55  ;;  %v737_v59 = vsub.f32 %v728_v38, %v736_v58 }
 0x343   : > { %v738_v60 = vmul.f32 1.442695, %v737_v59 }
 0x345   : > { %1185 = vpow2.f32 %v738_v60 }
 0x347   : > { %v1184_v56 = vpop.eup %1183 }
 0x348   : > { %v624_v57 = vsel %vm343_vm2, %v1184_v56, 0.0 }
 0x349   : > { %625 = vadd.xlane.f32.xlu0 %v624_v57 }
 0x34f   : > { %v1186_v61 = vpop.eup %1185 }
 0x350   : > { %v740_v62 = vsel %vm343_vm2, %v1186_v61, 0.0 }
 0x352   : > { %514 = vrot.lane.b32.xlu1 %v1602_v10, %s1367_s15  ;;  %s1673_s15 = scalar_lea.hbm %s1723_s5, %s1001_s11 }
 0x35f   : > { %402 = vrot.lane.b32.xlu0 %v1602_v10, %s1368_s16  ;;  %s1374_s16 = smov [#allocation9]  }
 0x363   : > { %746 = vrot.lane.b32.xlu0 %v1602_v10, %s1369_s9  ;;  %s1285_s9 = sshll.u32 %s1374_s16, 4  ;;  %s1286_s9 = int_to_ptr.vmem [resolvable:$false] %s1285_s9 }
 0x364   : > { %p1288_p7 = scmp.lt.s32.totalorder %s1675_s7, %s1286_s9 }
 0x376   : > { %741 = vadd.xlane.f32.xlu1 %v740_v62 }
 0x387   : > { %630 = vrot.lane.b32.xlu1 %v1602_v10, %s1370_s29  ;;  %s1287_s29 = scalar_lea.vmem %s1286_s9, 256 }
 0x388   : > { %p1289_p9 = scmp.lt.s32.totalorder %s1287_s29, %s1281_s13 }
 0x38a   : > { %p1290_p12 = por %p1289_p9, %p1288_p7 }
 0x38c   : > { %p1291_p2 = pnand %p1290_p12, %p1284_p3 }
 0x3c6   : > { %v398_v63 = vpop.xlane.xlu0 %397 }
 0x3c7   : > { %1187 = vrcp.f32 %v398_v63 }
 0x3ce   : > { %v510_v1 = vpop.xlane.xlu1 %509 }
 0x3cf   : > { %1189 = vrcp.f32 %v510_v1 }
 0x3d1   : > { %v1188_v2 = vpop.eup %1187 }
 0x3d2   : > { %v400_v4 = vmul.f32 %v1188_v2, %v1180_v49  ;;  %v515_v7 = vpop.permute.xlu1 %514 }
 0x3d3   : > { %v520_v11 = vsel %vm407_vm3, %v515_v7, 0 }
 0x3d4   : > { %v401_v8 = vpack.c.bf16 %v400_v4, %v400_v4 }
 0x3d6   : > { %v626_v3 = vpop.xlane.xlu0 %625 }
 0x3d7   : > { %1191 = vrcp.f32 %v626_v3 }
 0x3d9   : > { %v1190_v9 = vpop.eup %1189 }
 0x3da   : > { %v403_v5 = vpop.permute.xlu0 %402  ;;  %v512_v10 = vmul.f32 %v1190_v9, %v1182_v54 }
 0x3db   : > { %v409_v6 = vsel %vm407_vm3, %v403_v5, 0 }
 0x3dc   : > { %1041 = vmatpush3.bf16.msra.mxu0 %v409_v6  ;;  %v513_v12 = vpack.c.bf16 %v512_v10, %v512_v10 }
 0x3dd   : > { %1052 = vmatprep.subr.bf16.mxu0 %v1358_v0 }
 0x3de   : > { %v747_v18 = vpop.permute.xlu0 %746 }
 0x3df   : > { %1043 = vmatmul.mubr.msk.bf16.vlgmr.msra.gmra.mrb[4].mxu0 %vm343_vm2, %v401_v8  ;;  %v752_v20 = vsel %vm407_vm3, %v747_v18, 0 }
 0x3e0   : > { %1053 = vmatpush3.bf16.msra.mxu0 %v520_v11  ;;  %1054 = vmatprep.mubr.msk.bf16.mxu0 %vm1359_vm0, %v1358_v0 }
 0x3e1   : > { %1064 = vmatprep.subr.bf16.mxu0 %v1358_v0  ;;  %v1192_v13 = vpop.eup %1191 }
 0x3e2   : > { %v628_v15 = vmul.f32 %v1192_v13, %v1184_v56 }
 0x3e4   : > { %v629_v19 = vpack.c.bf16 %v628_v15, %v628_v15 }
 0x3e7   : > { %1055 = vmatmul.mubr.msk.bf16.vlgmr.msra.gmra.mrb[8].mxu0 %vm343_vm2, %v513_v12 }
 0x3e8   : > { %1066 = vmatprep.mubr.msk.bf16.mxu0 %vm1359_vm0, %v1358_v0 }
 0x403   : > { %v742_v14 = vpop.xlane.xlu1 %741 }
 0x404   : > { %1193 = vrcp.f32 %v742_v14 }
 0x407   : > { %v631_v16 = vpop.permute.xlu1 %630 }
 0x408   : > { %v636_v17 = vsel %vm407_vm3, %v631_v16, 0 }
 0x409   : > { %1065 = vmatpush3.bf16.msra.mxu0 %v636_v17 }
 0x40a   : > { %1076 = vmatprep.subr.bf16.mxu0 %v1358_v0 }
 0x40c   : > { %1067 = vmatmul.mubr.msk.bf16.vlgmr.msra.gmra.mrb[12].mxu0 %vm343_vm2, %v629_v19 }
 0x40d   : > { %1077 = vmatpush3.bf16.msra.mxu0 %v752_v20  ;;  %1078 = vmatprep.mubr.msk.bf16.mxu0 %vm1359_vm0, %v1358_v0 }
 0x40e   : > { %v1194_v21 = vpop.eup %1193 }
 0x40f   : > { %v744_v22 = vmul.f32 %v1194_v21, %v1186_v61 }
 0x411   : > { %v745_v23 = vpack.c.bf16 %v744_v22, %v744_v22 }
 0x414   : > { %1079 = vmatmul.mubr.msk.bf16.vlgmr.msra.gmra.mrb[16].mxu0 %vm343_vm2, %v745_v23 }
 0x4b2   : > { %v445_v24 = vpop.f32.mrb[4].mxu0 }
 0x4b3   : > { %451 = vst.msk [vmem:[#allocation2] sm:$0xff] %vm343_vm2, %v445_v24  ;;  %v1044_v25 = vpop.f32.mrb[5].mxu0 }
 0x4b4   : > { %v448_v26 = vpop.f32.mrb[6].mxu0 }
 0x4b5   : > { %v1045_v27 = vpop.f32.mrb[7].mxu0 }
 0x4ba   : > { %v556_v28 = vpop.f32.mrb[8].mxu0 }
 0x4bb   : > { %563 = vrot.lane.b32.xlu1 %v556_v28, %s1371_s17  ;;  %v1056_v29 = vpop.f32.mrb[9].mxu0 }
 0x4bc   : > { %v559_v30 = vpop.f32.mrb[10].mxu0 }
 0x4bd   : > { %v1057_v31 = vpop.f32.mrb[11].mxu0 }
 0x4df   : > { %v672_v34 = vpop.f32.mrb[12].mxu0 }
 0x4e0   : > { %679 = vrot.lane.b32.xlu0 %v672_v34, %s1372_s24  ;;  %v1068_v35 = vpop.f32.mrb[13].mxu0 }
 0x4e1   : > { %v675_v36 = vpop.f32.mrb[14].mxu0 }
 0x4e2   : > { %v1069_v37 = vpop.f32.mrb[15].mxu0 }
 0x4e7   : > { %v788_v38 = vpop.f32.mrb[16].mxu0 }
 0x4e8   : > { %795 = vrot.lane.b32.xlu1 %v788_v38, %s1373_s26  ;;  %v1080_v39 = vpop.f32.mrb[17].mxu0 }
 0x4e9   : > { %v791_v40 = vpop.f32.mrb[18].mxu0 }
 0x4ea   : > { %v1081_v41 = vpop.f32.mrb[19].mxu0 }
 0x52d   : > { %v564_v42 = vpop.permute.xlu1 %563 }
 0x52e   : > { %567 = vst.msk [vmem:[#allocation2] sm:$0xff] %vm566_vm4, %v564_v42 }
 0x552   : > { %v680_v0 = vpop.permute.xlu0 %679 }
 0x553   : > { %683 = vst.msk [vmem:[#allocation2] sm:$0xff] %vm682_vm5, %v680_v0 }
 0x55a   : > { %v796_v43 = vpop.permute.xlu1 %795 }
 0x55b   : > { %799 = vst.msk [vmem:[#allocation2] sm:$0xff] %vm798_vm6, %v796_v43 }
 0x562   : > { %v800_v44 = vld [vmem:[#allocation2] sm:$0xff] }
 0x563   : > { %v801_v45 = vpack.c.bf16 %v800_v44, %v800_v44 }
 0x565   : > { %1087 = vmatmul.mubr.msk.bf16.vlgmr.msra.gmra.mrb[16].mxu1 %vm295_vm1, %v801_v45 }
 0x638   : > { %v862_v47 = vpop.f32.mrb[16].mxu1 }
 0x639   : > { %v863_v48 = vadd.f32 %v996_v46, %v862_v47  ;;  %v1088_v49 = vpop.f32.mrb[17].mxu1 }
 0x63a   : > { %v865_v50 = vpop.f32.mrb[18].mxu1 }
 0x63b   : > { %v1089_v51 = vpop.f32.mrb[19].mxu1  ;;  %868 = vst.msk [vmem:[%s268_s28] sm:$0xff] %vm295_vm1, %v863_v48 }
 0x63c   : > { %1294 = shalt.err (!%p1291_p2)
}
 0x63d   : > { %s1295_s12 = scalar_lea.hbm %s1673_s15, 128  ;;  %s1299_s26 = scalar_lea.hbm %s1723_s5, 256 }
 0x63e   : > { %p1296_p13 = scmp.ne.s32.totalorder %s1673_s15, %s1295_s12  ;;  %p1300_p4 = scmp.lt.u32.totalorder %s1673_s15, %s1723_s5 }
 0x63f   : > { %p1301_p5 = scmp.lt.u32.totalorder %s1299_s26, %s1295_s12  ;;  %p1303_p11 = scmp.lt.u32.totalorder %s1295_s12, %s1673_s15 }
 0x640   : > { %p1297_p6 = pnand %p1296_p13, %p1737_p0 }
 0x641   : > { %p1302_p8 = por %p1301_p5, %p1300_p4 }
 0x642   : > { %p1298_p10 = pneg %p1297_p6 }
 0x643   : > { %p1304_p1 = por %p1303_p11, %p1302_p8 }
 0x645   : > { %p1305_p3 = pnand %p1304_p1, %p1298_p10 }
 0x647   : > { %1308 = shalt.err (!%p1305_p3)
}
 0x648   : > { %1100 = dma.vmem_to_hbm [thread:$0]  (%p1737_p0), %s1675_s7, 128, %s1673_s15, %s870_s22  }
 0x649 PF: > { %s895_s11 = sand.u32 1, %s1339_s18   ;;  %p1738_p7 = scmp.ne.s32.totalorder %s1728_s25, 0 }
 0x64a   : > { %p1739_p9 = scmp.ge.s32.totalorder %s1351_s21, 2  ;;  %s896_s28 = scalar_lea.sflag [#allocation5], %s895_s11 }
 0x64c   : > { %p1114_p12 = pnand %p1739_p9, %p1738_p7 }
 0x64e   : > { %1334 = dma.done.wait (!%p1114_p12), %s896_s28, 128  }
 0x64f   : > { %1336 = vsyncadd (!%p1114_p12), %s896_s28, 4294967168  ;;  %p19_p2 = scmp.ge.s32.totalorder %s1515_s14, 4   ;;  %s1740_s18 = smov %s1343_s19 }
 0x650   : > { %s1741_s19 = smov %s1347_s20  ;;  %s1742_s20 = smov %s1531_s27 }
 0x651   : > { %s1743_s21 = smov %s1515_s14  ;;  %21 = sbr.rel (!%p19_p2) target bundleno = 6 (0x6), region = 93 }
 0x658   :  { %901 = vsyncpa [#allocation4], 1 }
 0x659   :  { %903 = vsyncpa [#allocation4 + $0x1], 1 }
 0x65a   :  { %904 = vsyncpa [#allocation7], 1 }
 0x65b   :  { %905 = vsyncpa [#allocation5], 1 }
 0x65c   :  { %907 = vsyncpa [#allocation5 + $0x1], 1 }

</bundles_post_ra>
